<compile_context>
chip_gen: v7x
topology: tpu7x:2x2x1
jax: 0.10.0
libtpu: 0.0.40
codegen_flags: <defaults>
</compile_context>

<pallas_src>
import jax
import jax.numpy as jnp
from jax import lax
from jax.experimental import pallas as pl
from jax.experimental.pallas import tpu as pltpu

IN_FEATURES = 20
OUT_FEATURES = 2
DEFAULT_TILE_B = 8192      # multiple of 128 -> lane-dense transposed out block
MIN_KERNEL_BATCH = 2048    # below this, plain jnp.dot beats kernel launch cost


def _round_up(n, m):
    return ((n + m - 1) // m) * m


def _linear_kernel(x_ref, w_ref, b_ref, o_ref):
    # x_ref: (tile_b, F)  in x's native dtype (no per-tile cast)
    # w_ref: (OUT, F)     same dtype as x, resident across all batch tiles
    # b_ref: (OUT, 1)     float32, resident
    # o_ref: (OUT, tile_b) float32 -> lane-dense (unmasked stores)
    logits_t = lax.dot_general(
        w_ref[...], x_ref[...],
        dimension_numbers=(((1,), (1,)), ((), ())),   # contract feature dims
        preferred_element_type=jnp.float32,
    )                                                  # (OUT, tile_b)
    o_ref[...] = (logits_t + b_ref[...]).astype(o_ref.dtype)


def logistic_regression_forward(x, weight, bias, *, tile_b=DEFAULT_TILE_B,
                                min_kernel_batch=MIN_KERNEL_BATCH):
    """logits = x @ weight.T + bias   (module: x = x.to(weight.dtype); linear(x))

    x:      (B, 20) float dtype
    weight: (2, 20) float32
    bias:   (2,)    float32
    returns (B, 2)  weight.dtype (float32)
    """
    B = x.shape[0]
    out_dtype = weight.dtype

    # --- Small-batch fallback: launch + per-step overhead can't be amortized.
    if B < min_kernel_batch:
        xw = x.astype(weight.dtype)            # exact module semantics
        return (xw @ weight.T + bias).astype(out_dtype)

    # --- One-time cast of the tiny resident operands instead of casting the
    #     whole x tile every grid step (MXU takes bf16 natively; f32 accum).
    w = weight if weight.dtype == x.dtype else weight.astype(x.dtype)   # (OUT, F)
    b2d = bias.astype(jnp.float32).reshape(OUT_FEATURES, 1)             # (OUT, 1)

    # --- Tile selection: large tiles amortize step overhead; keep >= 2 grid
    #     steps so both v7x TensorCores are used; multiple of 128 keeps the
    #     transposed output block lane-dense and legal.
    tb = min(tile_b, _round_up(pl.cdiv(B, 2), 128))
    tb = max(tb, 128)
    grid = (pl.cdiv(B, tb),)

    # --- Explicit VMEM budget (double-buffered, lane/sublane padded tiles).
    x_itemsize = x.dtype.itemsize
    x_tile_bytes = 2 * tb * 128 * x_itemsize          # 20 lanes pad to 128
    o_tile_bytes = 2 * 8 * tb * 4                     # 2 sublanes pad to 8, f32
    vmem_limit = min(max(x_tile_bytes + o_tile_bytes + (2 << 20), 16 << 20),
                     48 << 20)                        # fits v7x's 64 MiB VMEM

    cost = pl.CostEstimate(
        flops=2 * B * IN_FEATURES * OUT_FEATURES,
        transcendentals=0,
        bytes_accessed=(B * IN_FEATURES * x_itemsize            # read x
                        + B * OUT_FEATURES * 4                  # write logits
                        + IN_FEATURES * OUT_FEATURES * x_itemsize
                        + OUT_FEATURES * 4),
    )

    logits_t = pl.pallas_call(
        _linear_kernel,
        out_shape=jax.ShapeDtypeStruct((OUT_FEATURES, B), out_dtype),
        grid=grid,
        in_specs=[
            pl.BlockSpec((tb, IN_FEATURES), lambda i: (i, 0)),            # x tile
            pl.BlockSpec((OUT_FEATURES, IN_FEATURES), lambda i: (0, 0)),  # W resident
            pl.BlockSpec((OUT_FEATURES, 1), lambda i: (0, 0)),            # bias resident
        ],
        out_specs=pl.BlockSpec((OUT_FEATURES, tb), lambda i: (0, i)),     # lane-dense
        compiler_params=pltpu.CompilerParams(
            dimension_semantics=("parallel",),   # megacore sharding on v7x
            vmem_limit_bytes=vmem_limit,
        ),
        cost_estimate=cost,
    )(x, w, b2d)

    return logits_t.T   # (B, OUT) — cheap, contiguous wrapper-side transpose


def init_params(key):
    """Matches the module's __init__:
    weight: (2, 20) ~ Normal(0, 0.01); bias: (2,) ~ U(-1/sqrt(20), 1/sqrt(20)).
    """
    k_w, k_b = jax.random.split(key)
    weight = 0.01 * jax.random.normal(k_w, (OUT_FEATURES, IN_FEATURES), jnp.float32)
    bound = 1.0 / jnp.sqrt(jnp.float32(IN_FEATURES))
    bias = jax.random.uniform(k_b, (OUT_FEATURES,), jnp.float32, -bound, bound)
    return weight, bias


if __name__ == "__main__":
    key = jax.random.PRNGKey(0)
    k_param, k_x1, k_x2, k_x3 = jax.random.split(key, 4)

    weight, bias = init_params(k_param)

    # Case 1: tiny batch -> small-batch fallback path (plain XLA matmul).
    x_small = jax.random.normal(k_x1, (8, IN_FEATURES), jnp.float32)
    out_small = logistic_regression_forward(x_small, weight, bias)
    jax.block_until_ready(out_small)
    ref_small = x_small @ weight.T + bias
    assert out_small.shape == (8, OUT_FEATURES)
    assert jnp.allclose(out_small, ref_small, atol=1e-5, rtol=1e-5)

    # Case 2: Pallas path, f32, two grid steps with an uneven tail (B=2500).
    x_mid = jax.random.normal(k_x2, (2500, IN_FEATURES), jnp.float32)
    out_mid = logistic_regression_forward(x_mid, weight, bias)
    jax.block_until_ready(out_mid)
    ref_mid = x_mid @ weight.T + bias
    assert out_mid.shape == (2500, OUT_FEATURES)
    assert out_mid.dtype == jnp.float32
    assert jnp.allclose(out_mid, ref_mid, atol=1e-4, rtol=1e-4)

    # Case 3: Pallas path, bf16 input (weight cast to bf16 once in the wrapper,
    # f32 accumulation on the MXU).
    x_bf16 = jax.random.normal(k_x3, (4096, IN_FEATURES), jnp.float32).astype(jnp.bfloat16)
    out_bf16 = logistic_regression_forward(x_bf16, weight, bias)
    jax.block_until_ready(out_bf16)
    w_bf16 = weight.astype(jnp.bfloat16).astype(jnp.float32)
    ref_bf16 = x_bf16.astype(jnp.float32) @ w_bf16.T + bias
    assert out_bf16.shape == (4096, OUT_FEATURES)
    assert out_bf16.dtype == jnp.float32
    assert jnp.allclose(out_bf16, ref_bf16, atol=1e-2, rtol=1e-2)

    print("KERNEL_OK")
</pallas_src>

<mosaic_0001>
module attributes {stable_mosaic.version = 11 : i64} {
  func.func @_linear_kernel(%arg0: i32, %arg1: memref<1280x20xf32, #tpu.memory_space<vmem>>, %arg2: memref<2x20xf32, #tpu.memory_space<vmem>>, %arg3: memref<2x1xf32, #tpu.memory_space<vmem>>, %arg4: memref<2x1280xf32, #tpu.memory_space<vmem>>) attributes {dimension_semantics = [#tpu.dimension_semantics<parallel>], iteration_bounds = array<i64: 2>, scalar_prefetch = 0 : i64, scratch_operands = 0 : i64, tpu.core_type = #tpu.core_type<tc>, window_params = [{transform_indices = @transform_0, window_bounds = array<i64: 1280, 20>}, {pipeline_mode = #tpu.pipeline_mode<synchronous>, transform_indices = @transform_1, window_bounds = array<i64: 2, 20>}, {pipeline_mode = #tpu.pipeline_mode<synchronous>, transform_indices = @transform_2, window_bounds = array<i64: 2, 1>}, {transform_indices = @transform_3, window_bounds = array<i64: 2, 1280>}]} {
    %c0 = arith.constant 0 : index
    %c0_0 = arith.constant 0 : index
    %0 = vector.load %arg2[%c0, %c0_0] : memref<2x20xf32, #tpu.memory_space<vmem>>, vector<2x20xf32>
    %c0_1 = arith.constant 0 : index
    %c0_2 = arith.constant 0 : index
    %1 = vector.load %arg1[%c0_1, %c0_2] : memref<1280x20xf32, #tpu.memory_space<vmem>>, vector<1280x20xf32>
    %cst = arith.constant dense<0.000000e+00> : vector<2x1280xf32>
    %2 = tpu.matmul %0, %1, %cst {dimension_numbers = #tpu.dot_dimension_numbers<[1], [1], [0], [0], [0, 0, 1, 0], [], []>} : vector<2x20xf32>, vector<1280x20xf32>, vector<2x1280xf32> -> vector<2x1280xf32>
    %c0_3 = arith.constant 0 : index
    %c0_4 = arith.constant 0 : index
    %3 = vector.load %arg3[%c0_3, %c0_4] : memref<2x1xf32, #tpu.memory_space<vmem>>, vector<2x1xf32>
    %4 = vector.broadcast %3 : vector<2x1xf32> to vector<2x1280xf32>
    %5 = arith.addf %2, %4 : vector<2x1280xf32>
    %c0_5 = arith.constant 0 : index
    %c0_6 = arith.constant 0 : index
    %6 = vector.load %arg4[%c0_5, %c0_6] : memref<2x1280xf32, #tpu.memory_space<vmem>>, vector<2x1280xf32>
    tpu.vector_store %arg4[%c0_5, %c0_6], %5 {strides = array<i32>} : memref<2x1280xf32, #tpu.memory_space<vmem>>, vector<2x1280xf32>,
    return
  }
  func.func @transform_0(%arg0: i32) -> (i32, i32) {
    %c0_i32 = arith.constant 0 : i32
    %c0_i32_0 = arith.constant 0 : i32
    return %arg0, %c0_i32 : i32, i32
  }
  func.func @transform_1(%arg0: i32) -> (i32, i32) {
    %c0_i32 = arith.constant 0 : i32
    %c0_i32_0 = arith.constant 0 : i32
    %c0_i32_1 = arith.constant 0 : i32
    return %c0_i32, %c0_i32_0 : i32, i32
  }
  func.func @transform_2(%arg0: i32) -> (i32, i32) {
    %c0_i32 = arith.constant 0 : i32
    %c0_i32_0 = arith.constant 0 : i32
    %c0_i32_1 = arith.constant 0 : i32
    return %c0_i32, %c0_i32_0 : i32, i32
  }
  func.func @transform_3(%arg0: i32) -> (i32, i32) {
    %c0_i32 = arith.constant 0 : i32
    %c0_i32_0 = arith.constant 0 : i32
    return %c0_i32, %arg0 : i32, i32
  }
}

</mosaic_0001>

<bundles_post_ra>
// kernel: tpu_custom_call.1
= control target key start
LH: loop header
LB: loop body
LE: loop exit
PB: predicated region body
PF: predicated region fallthrough
CT: control target
= control target key end

     0   :  { %8 = vsyncpa [#allocation3], 0  ;;  %s2504_s0 = inlined_call_operand.vmem [shape: f32[2500,20], index: 0, kind: input, shape index: {}]   ;;  %s2505_s1 = inlined_call_operand.vmem [shape: f32[2,20], index: 1, kind: input, shape index: {}]   ;;  %s2506_s2 = inlined_call_operand.vmem [shape: f32[2,1], index: 2, kind: input, shape index: {}]   ;;  %s2507_s3 = inlined_call_operand.hbm [shape: f32[2,2500], index: 3, kind: output, shape index: {}]  }
   0x1   :  { %10 = vsyncpa [#allocation3 + $0x1], 0  ;;  %s2045_s12 = smov 0   ;;  %s2047_s13 = smov 0  }
   0x2   :  { %s2049_s14 = smov 0   ;;  %s2051_s15 = smov 0  }
   0x3 LB: > { %s2066_s16 = sadd.s32 4294967295, %s2020_s15   ;;  %s1330_s17 = sadd.s32 4294967294, %s2020_s15   ;;  %s2020_s15 = sphi %s2051_s15, %s2515_s15   ;;  %s2016_s14 = sphi %s2049_s14, %s2514_s14   ;;  %s2012_s13 = sphi %s2047_s13, %s2513_s13   ;;  %s2008_s12 = sphi %s2045_s12, %s2512_s12  }
   0x4   : > { %s2070_s18 = sadd.s32 1, %s2020_s15   ;;  %s91_s19 = sadd.s32 1, %s2016_s14 }
   0x5   : > { %s88_s20 = ssub.s32 %s2020_s15, %s2070_s18  ;;  %p101_p0 = scmp.ne.s32.totalorder %s2016_s14, %s2012_s13 }
   0x6   : > { %p89_p1 = scmp.eq.s32.totalorder %s88_s20, 0  ;;  %p102_p2 = scmp.eq.s32.totalorder %s2066_s16, 1 }
   0x7   : > { %p107_p3 = scmp.ne.s32.totalorder %s2012_s13, %s2008_s12  ;;  %p108_p4 = scmp.eq.s32.totalorder %s1330_s17, 1 }
   0x8   : > { %s2081_s21 = scalar_select %p89_p1, %s2016_s14, %s91_s19  }
   0x9   : > { %p2083_p5 = por %p102_p2, %p101_p0  ;;  %p2087_p6 = por %p108_p4, %p107_p3 }
   0xa   : > { %p1333_p7 = scmp.ge.s32.totalorder %s2020_s15, 1  ;;  %p149_p8 = scmp.lt.s32.totalorder %s2020_s15, 3 }
   0xc   : > { %p150_p9 = pnand %p1333_p7, %p149_p8 }
   0xd   : > { %s177_s24 = smul.u32 (!%p150_p9), 160, %s2066_s16  ;;  %vm359_vm0 = vcmask (!%p150_p9), 162816   ;;  %v2097_v0 = vld [vmem:[%s2505_s1] sm:$0x3] (!%p150_p9)  ;;  %v2022_v50 = vmov (!%p150_p9), 0   ;;  %s174_s6 = sand.u32 (!%p150_p9), 1, %s2012_s13  }
   0xe   : > { %153 = sbr.rel (%p150_p9) target bundleno = 451 (0x1c3), region = 32  ;;  %1537 = vmatprep.mubr.msk.f32.mxu0 (!%p150_p9), %vm359_vm0, %v2097_v0  ;;  %1571 = vmatprep.mubr.msk.f32.mxu1 (!%p150_p9), %vm359_vm0, %v2097_v0  ;;  %vm2110_vm1 = vmpackc.low (!%p150_p9), %vm359_vm0, %vm359_vm0  ;;  %s1257_s20 = scalar_lea.sflag (!%p150_p9), [#allocation3], %s174_s6 }
   0xf   : > { %p182_p10 = scmp.lt.s32.totalorder (!%p150_p9), %s177_s24, 312  ;;  %1957 = vset.pattern.permute.xlu0 (!%p150_p9), %v2022_v50  ;;  %s1915_s7 = smul.u32 (!%p150_p9), 20, %s174_s6 }
  0x10   : > { %s1504_s9 = smul.u32 (!%p150_p9), 320, %s2066_s16  ;;  %s2024_s16 = smov (!%p150_p9), [#allocation2]  }
  0x11   : > { %s176_s8 = scalar_lea.vmem (!%p150_p9), [#allocation2], %s1915_s7  ;;  %s1962_s25 = sshll.u32 (!%p150_p9), %s2024_s16, 4  ;;  %s1963_s25 = int_to_ptr.vmem [resolvable:$false] %s1962_s25 }
  0x12   : > { %s1271_s10 = sshll.u32 (!%p150_p9), %s176_s8, 4  ;;  %s2460_s19 = scalar_lea.hbm (!%p150_p9), %s2507_s3, %s1504_s9  ;;  %s2462_s10 = int_to_ptr.vmem [resolvable:$true] %s1271_s10 }
  0x13   : > { %s1964_s26 = scalar_lea.vmem (!%p150_p9), %s1963_s25, 640  ;;  %p1965_p0 = scmp.lt.s32.totalorder (!%p150_p9), %s2462_s10, %s1963_s25 }
  0x15   : > { %s2517_s24 = smov (!%p182_p10, %s177_s24), 312 }
  0x16   : > { %s1334_s27 = sshll.u32 %s2517_s24, 3  ;;  %s1958_s24 = scalar_lea.vmem %s2462_s10, 320 }
  0x17   : > { %s2106_s30 = scalar_lea.vmem %s2504_s0, %s1334_s27  ;;  %p1959_p11 = scmp.ne.s32.totalorder %s2462_s10, %s1958_s24 }
  0x18   : > { %v209_v2 = vld [vmem:[%s2106_s30 + $0x80] sm:$0xff]  ;;  %v210_v3 = vld [vmem:[%s2106_s30 + $0x88] sm:$0xff]  ;;  %v211_v13 = vld [vmem:[%s2106_s30 + $0x90] sm:$0xff]  ;;  %p1966_p1 = scmp.lt.s32.totalorder %s1964_s26, %s1958_s24 }
  0x19   : > { %v241_v4 = vld [vmem:[%s2106_s30 + $0x180] sm:$0xff]  ;;  %v1675_v5 = vpack.c.bf16 %v210_v3, %v209_v2  ;;  %v242_v6 = vld [vmem:[%s2106_s30 + $0x188] sm:$0xff]  ;;  %v212_v15 = vld [vmem:[%s2106_s30 + $0x98] sm:$0xff]  ;;  %p1960_p12 = pnand %p1959_p11, %p2083_p5 }
  0x1a   : > { %v193_v7 = vld [vmem:[%s2106_s30] sm:$0xff]  ;;  %v194_v8 = vld [vmem:[%s2106_s30 + $0x8] sm:$0xff]  ;;  %v1723_v9 = vpack.c.bf16 %v242_v6, %v241_v4  ;;  %v243_v16 = vld [vmem:[%s2106_s30 + $0x190] sm:$0xff]  ;;  %v1681_v18 = vpack.c.bf16 %v212_v15, %v211_v13  ;;  %p1967_p2 = por %p1966_p1, %p1965_p0 }
  0x1b   : > { %v1678_v10 = vpack.c.bf16 %v194_v8, %v193_v7  ;;  %v225_v11 = vld [vmem:[%s2106_s30 + $0x100] sm:$0xff]  ;;  %v226_v12 = vld [vmem:[%s2106_s30 + $0x108] sm:$0xff]  ;;  %1677 = vmatprep.subr.msk.bf16.mxu0 %vm2110_vm1, %v1675_v5  ;;  %v244_v17 = vld [vmem:[%s2106_s30 + $0x198] sm:$0xff]  ;;  %p1961_p13 = pneg %p1960_p12 }
  0x1c   : > { %v1726_v14 = vpack.c.bf16 %v226_v12, %v225_v11  ;;  %1725 = vmatprep.subr.msk.bf16.mxu1 %vm2110_vm1, %v1723_v9  ;;  %v1729_v19 = vpack.c.bf16 %v244_v17, %v243_v16  ;;  %v195_v20 = vld [vmem:[%s2106_s30 + $0x10] sm:$0xff]  ;;  %v196_v21 = vld [vmem:[%s2106_s30 + $0x18] sm:$0xff]  ;;  %v213_v24 = vld [vmem:[%s2106_s30 + $0xa0] sm:$0xff] }
  0x1d   : > { %1680 = vmatpush3.bf16.xpose.msk.msra.mxu0 %vm2110_vm1, %v1678_v10  ;;  %v227_v22 = vld [vmem:[%s2106_s30 + $0x110] sm:$0xff]  ;;  %v228_v23 = vld [vmem:[%s2106_s30 + $0x118] sm:$0xff]  ;;  %v214_v25 = vld [vmem:[%s2106_s30 + $0xa8] sm:$0xff]  ;;  %v1684_v28 = vpack.c.bf16 %v196_v21, %v195_v20  ;;  %p1968_p3 = pnand %p1967_p2, %p1961_p13 }
  0x1e   : > { %1728 = vmatpush3.bf16.xpose.msk.msra.mxu1 %vm2110_vm1, %v1726_v14  ;;  %1683 = vmatprep.subr.msk.bf16.mxu0 %vm2110_vm1, %v1681_v18  ;;  %v245_v26 = vld [vmem:[%s2106_s30 + $0x1a0] sm:$0xff]  ;;  %v246_v27 = vld [vmem:[%s2106_s30 + $0x1a8] sm:$0xff]  ;;  %v1732_v29 = vpack.c.bf16 %v228_v23, %v227_v22  ;;  %v1687_v30 = vpack.c.bf16 %v214_v25, %v213_v24  ;;  %v215_v36 = vld [vmem:[%s2106_s30 + $0xb0] sm:$0xff] }
  0x1f   : > { %1731 = vmatprep.subr.msk.bf16.mxu1 %vm2110_vm1, %v1729_v19  ;;  %v1735_v31 = vpack.c.bf16 %v246_v27, %v245_v26  ;;  %v197_v32 = vld [vmem:[%s2106_s30 + $0x20] sm:$0xff]  ;;  %v198_v33 = vld [vmem:[%s2106_s30 + $0x28] sm:$0xff]  ;;  %v216_v37 = vld [vmem:[%s2106_s30 + $0xb8] sm:$0xff] }
  0x20   : > { %v229_v34 = vld [vmem:[%s2106_s30 + $0x120] sm:$0xff]  ;;  %v230_v35 = vld [vmem:[%s2106_s30 + $0x128] sm:$0xff]  ;;  %v247_v38 = vld [vmem:[%s2106_s30 + $0x1b0] sm:$0xff]  ;;  %v1690_v40 = vpack.c.bf16 %v198_v33, %v197_v32  ;;  %v1693_v42 = vpack.c.bf16 %v216_v37, %v215_v36 }
  0x21   : > { %v248_v39 = vld [vmem:[%s2106_s30 + $0x1b8] sm:$0xff]  ;;  %v1738_v41 = vpack.c.bf16 %v230_v35, %v229_v34  ;;  %v199_v44 = vld [vmem:[%s2106_s30 + $0x30] sm:$0xff]  ;;  %v217_v48 = vld [vmem:[%s2106_s30 + $0xc0] sm:$0xff] }
  0x22   : > { %v1741_v43 = vpack.c.bf16 %v248_v39, %v247_v38  ;;  %v200_v45 = vld [vmem:[%s2106_s30 + $0x38] sm:$0xff]  ;;  %v231_v46 = vld [vmem:[%s2106_s30 + $0x130] sm:$0xff]  ;;  %v218_v49 = vld [vmem:[%s2106_s30 + $0xc8] sm:$0xff] }
  0x23   : > { %v232_v47 = vld [vmem:[%s2106_s30 + $0x138] sm:$0xff]  ;;  %v249_v51 = vld [vmem:[%s2106_s30 + $0x1c0] sm:$0xff]  ;;  %v250_v52 = vld [vmem:[%s2106_s30 + $0x1c8] sm:$0xff]  ;;  %v1696_v53 = vpack.c.bf16 %v200_v45, %v199_v44  ;;  %v1699_v55 = vpack.c.bf16 %v218_v49, %v217_v48 }
  0x24   : > { %v1744_v54 = vpack.c.bf16 %v232_v47, %v231_v46  ;;  %v1747_v56 = vpack.c.bf16 %v250_v52, %v249_v51  ;;  %v201_v57 = vld [vmem:[%s2106_s30 + $0x40] sm:$0xff]  ;;  %v202_v58 = vld [vmem:[%s2106_s30 + $0x48] sm:$0xff]  ;;  %v219_v61 = vld [vmem:[%s2106_s30 + $0xd0] sm:$0xff] }
  0x25   : > { %1686 = vmatpush3.bf16.xpose.msk.msra.mxu0 %vm2110_vm1, %v1684_v28  ;;  %v233_v59 = vld [vmem:[%s2106_s30 + $0x140] sm:$0xff]  ;;  %v234_v60 = vld [vmem:[%s2106_s30 + $0x148] sm:$0xff]  ;;  %v220_v62 = vld [vmem:[%s2106_s30 + $0xd8] sm:$0xff]  ;;  %v1702_v3 = vpack.c.bf16 %v202_v58, %v201_v57 }
  0x26   : > { %1734 = vmatpush3.bf16.xpose.msk.msra.mxu1 %vm2110_vm1, %v1732_v29  ;;  %1689 = vmatprep.subr.msk.bf16.mxu0 %vm2110_vm1, %v1687_v30  ;;  %v251_v63 = vld [vmem:[%s2106_s30 + $0x1d0] sm:$0xff]  ;;  %v252_v2 = vld [vmem:[%s2106_s30 + $0x1d8] sm:$0xff]  ;;  %v1750_v4 = vpack.c.bf16 %v234_v60, %v233_v59  ;;  %v1705_v5 = vpack.c.bf16 %v220_v62, %v219_v61  ;;  %v221_v11 = vld [vmem:[%s2106_s30 + $0xe0] sm:$0xff] }
  0x27   : > { %1737 = vmatprep.subr.msk.bf16.mxu1 %vm2110_vm1, %v1735_v31  ;;  %v1753_v6 = vpack.c.bf16 %v252_v2, %v251_v63  ;;  %v203_v7 = vld [vmem:[%s2106_s30 + $0x50] sm:$0xff]  ;;  %v204_v8 = vld [vmem:[%s2106_s30 + $0x58] sm:$0xff]  ;;  %v222_v12 = vld [vmem:[%s2106_s30 + $0xe8] sm:$0xff] }
  0x28   : > { %v235_v9 = vld [vmem:[%s2106_s30 + $0x150] sm:$0xff]  ;;  %v236_v10 = vld [vmem:[%s2106_s30 + $0x158] sm:$0xff]  ;;  %v253_v13 = vld [vmem:[%s2106_s30 + $0x1e0] sm:$0xff]  ;;  %v1708_v15 = vpack.c.bf16 %v204_v8, %v203_v7  ;;  %v1711_v17 = vpack.c.bf16 %v222_v12, %v221_v11 }
  0x29   : > { %v254_v14 = vld [vmem:[%s2106_s30 + $0x1e8] sm:$0xff]  ;;  %v1756_v16 = vpack.c.bf16 %v236_v10, %v235_v9  ;;  %v205_v19 = vld [vmem:[%s2106_s30 + $0x60] sm:$0xff]  ;;  %v223_v23 = vld [vmem:[%s2106_s30 + $0xf0] sm:$0xff] }
  0x2a   : > { %v1759_v18 = vpack.c.bf16 %v254_v14, %v253_v13  ;;  %v206_v20 = vld [vmem:[%s2106_s30 + $0x68] sm:$0xff]  ;;  %v237_v21 = vld [vmem:[%s2106_s30 + $0x160] sm:$0xff]  ;;  %v224_v24 = vld [vmem:[%s2106_s30 + $0xf8] sm:$0xff] }
  0x2b   : > { %v238_v22 = vld [vmem:[%s2106_s30 + $0x168] sm:$0xff]  ;;  %v353_v25 = vld [vmem:[%s2506_s2] sm:$0x3]  ;;  %v255_v26 = vld [vmem:[%s2106_s30 + $0x1f0] sm:$0xff]  ;;  %v1714_v28 = vpack.c.bf16 %v206_v20, %v205_v19  ;;  %v1717_v30 = vpack.c.bf16 %v224_v24, %v223_v23 }
  0x2c   : > { %v256_v27 = vld [vmem:[%s2106_s30 + $0x1f8] sm:$0xff]  ;;  %356 = vperm.xlu0 %1957, %v353_v25   ;;  %v1762_v29 = vpack.c.bf16 %v238_v22, %v237_v21  ;;  %v207_v32 = vld [vmem:[%s2106_s30 + $0x70] sm:$0xff]  ;;  %v273_v36 = vld [vmem:[%s2106_s30 + $0x280] sm:$0xff] }
  0x2d   : > { %1692 = vmatpush3.bf16.xpose.msk.msra.mxu0 %vm2110_vm1, %v1690_v40  ;;  %v1765_v31 = vpack.c.bf16 %v256_v27, %v255_v26  ;;  %v208_v33 = vld [vmem:[%s2106_s30 + $0x78] sm:$0xff]  ;;  %v239_v34 = vld [vmem:[%s2106_s30 + $0x170] sm:$0xff]  ;;  %v274_v37 = vld [vmem:[%s2106_s30 + $0x288] sm:$0xff] }
  0x2e   : > { %1740 = vmatpush3.bf16.xpose.msk.msra.mxu1 %vm2110_vm1, %v1738_v41  ;;  %1695 = vmatprep.subr.msk.bf16.mxu0 %vm2110_vm1, %v1693_v42  ;;  %v240_v35 = vld [vmem:[%s2106_s30 + $0x178] sm:$0xff]  ;;  %v305_v38 = vld [vmem:[%s2106_s30 + $0x380] sm:$0xff]  ;;  %v306_v39 = vld [vmem:[%s2106_s30 + $0x388] sm:$0xff]  ;;  %v1720_v40 = vpack.c.bf16 %v208_v33, %v207_v32  ;;  %v1771_v42 = vpack.c.bf16 %v274_v37, %v273_v36 }
  0x2f   : > { %1743 = vmatprep.subr.msk.bf16.mxu1 %vm2110_vm1, %v1741_v43  ;;  %v1768_v41 = vpack.c.bf16 %v240_v35, %v239_v34  ;;  %v1819_v43 = vpack.c.bf16 %v306_v39, %v305_v38  ;;  %v257_v44 = vld [vmem:[%s2106_s30 + $0x200] sm:$0xff]  ;;  %v258_v45 = vld [vmem:[%s2106_s30 + $0x208] sm:$0xff]  ;;  %v275_v48 = vld [vmem:[%s2106_s30 + $0x290] sm:$0xff] }
  0x30   : > { %v289_v46 = vld [vmem:[%s2106_s30 + $0x300] sm:$0xff]  ;;  %v290_v47 = vld [vmem:[%s2106_s30 + $0x308] sm:$0xff]  ;;  %v276_v49 = vld [vmem:[%s2106_s30 + $0x298] sm:$0xff]  ;;  %v1774_v52 = vpack.c.bf16 %v258_v45, %v257_v44 }
  0x31   : > { %v307_v50 = vld [vmem:[%s2106_s30 + $0x390] sm:$0xff]  ;;  %v308_v51 = vld [vmem:[%s2106_s30 + $0x398] sm:$0xff]  ;;  %v277_v60 = vld [vmem:[%s2106_s30 + $0x2a0] sm:$0xff] }
  0x32   : > { %v260_v57 = vld [vmem:[%s2106_s30 + $0x218] sm:$0xff]  ;;  %v291_v58 = vld [vmem:[%s2106_s30 + $0x310] sm:$0xff]  ;;  %v278_v61 = vld [vmem:[%s2106_s30 + $0x2a8] sm:$0xff] }
  0x33   : > { %v292_v59 = vld [vmem:[%s2106_s30 + $0x318] sm:$0xff]  ;;  %v309_v62 = vld [vmem:[%s2106_s30 + $0x3a0] sm:$0xff]  ;;  %v310_v63 = vld [vmem:[%s2106_s30 + $0x3a8] sm:$0xff] }
  0x34   : > { %v262_v7 = vld [vmem:[%s2106_s30 + $0x228] sm:$0xff]  ;;  %v293_v8 = vld [vmem:[%s2106_s30 + $0x320] sm:$0xff]  ;;  %v279_v10 = vld [vmem:[%s2106_s30 + $0x2b0] sm:$0xff] }
  0x35   : > { %1698 = vmatpush3.bf16.xpose.msk.msra.mxu0 %vm2110_vm1, %v1696_v53  ;;  %v1822_v53 = vpack.c.bf16 %v290_v47, %v289_v46  ;;  %v294_v9 = vld [vmem:[%s2106_s30 + $0x328] sm:$0xff]  ;;  %v280_v11 = vld [vmem:[%s2106_s30 + $0x2b8] sm:$0xff]  ;;  %v311_v12 = vld [vmem:[%s2106_s30 + $0x3b0] sm:$0xff] }
  0x36   : > { %1746 = vmatpush3.bf16.xpose.msk.msra.mxu1 %vm2110_vm1, %v1744_v54  ;;  %1701 = vmatprep.subr.msk.bf16.mxu0 %vm2110_vm1, %v1699_v55  ;;  %v1777_v54 = vpack.c.bf16 %v276_v49, %v275_v48  ;;  %v1825_v55 = vpack.c.bf16 %v308_v51, %v307_v50  ;;  %v312_v13 = vld [vmem:[%s2106_s30 + $0x3b8] sm:$0xff]  ;;  %v295_v20 = vld [vmem:[%s2106_s30 + $0x330] sm:$0xff]  ;;  %v281_v22 = vld [vmem:[%s2106_s30 + $0x2c0] sm:$0xff] }
  0x37   : > { %1749 = vmatprep.subr.msk.bf16.mxu1 %vm2110_vm1, %v1747_v56  ;;  %v259_v56 = vld [vmem:[%s2106_s30 + $0x210] sm:$0xff]  ;;  %v264_v19 = vld [vmem:[%s2106_s30 + $0x238] sm:$0xff]  ;;  %v282_v23 = vld [vmem:[%s2106_s30 + $0x2c8] sm:$0xff] }
  0x38   : > { %v1780_v2 = vpack.c.bf16 %v260_v57, %v259_v56  ;;  %v296_v21 = vld [vmem:[%s2106_s30 + $0x338] sm:$0xff]  ;;  %v313_v24 = vld [vmem:[%s2106_s30 + $0x3c0] sm:$0xff]  ;;  %v314_v25 = vld [vmem:[%s2106_s30 + $0x3c8] sm:$0xff] }
  0x39   : > { %v1840_v27 = vpack.c.bf16 %v296_v21, %v295_v20  ;;  %v297_v32 = vld [vmem:[%s2106_s30 + $0x340] sm:$0xff]  ;;  %v298_v33 = vld [vmem:[%s2106_s30 + $0x348] sm:$0xff]  ;;  %v283_v34 = vld [vmem:[%s2106_s30 + $0x2d0] sm:$0xff] }
  0x3a   : > { %v284_v35 = vld [vmem:[%s2106_s30 + $0x2d8] sm:$0xff]  ;;  %v315_v36 = vld [vmem:[%s2106_s30 + $0x3d0] sm:$0xff]  ;;  %v1846_v39 = vpack.c.bf16 %v298_v33, %v297_v32  ;;  %v285_v46 = vld [vmem:[%s2106_s30 + $0x2e0] sm:$0xff] }
  0x3b   : > { %v316_v37 = vld [vmem:[%s2106_s30 + $0x3d8] sm:$0xff]  ;;  %v299_v44 = vld [vmem:[%s2106_s30 + $0x350] sm:$0xff]  ;;  %v286_v47 = vld [vmem:[%s2106_s30 + $0x2e8] sm:$0xff] }
  0x3c   : > { %v300_v45 = vld [vmem:[%s2106_s30 + $0x358] sm:$0xff]  ;;  %v317_v48 = vld [vmem:[%s2106_s30 + $0x3e0] sm:$0xff]  ;;  %v318_v49 = vld [vmem:[%s2106_s30 + $0x3e8] sm:$0xff] }
  0x3d   : > { %1704 = vmatpush3.bf16.xpose.msk.msra.mxu0 %vm2110_vm1, %v1702_v3  ;;  %v1828_v3 = vpack.c.bf16 %v292_v59, %v291_v58  ;;  %v1852_v51 = vpack.c.bf16 %v300_v45, %v299_v44  ;;  %v301_v56 = vld [vmem:[%s2106_s30 + $0x360] sm:$0xff]  ;;  %v302_v57 = vld [vmem:[%s2106_s30 + $0x368] sm:$0xff]  ;;  %v287_v58 = vld [vmem:[%s2106_s30 + $0x2f0] sm:$0xff] }
  0x3e   : > { %1752 = vmatpush3.bf16.xpose.msk.msra.mxu1 %vm2110_vm1, %v1750_v4  ;;  %1707 = vmatprep.subr.msk.bf16.mxu0 %vm2110_vm1, %v1705_v5  ;;  %v1783_v4 = vpack.c.bf16 %v278_v61, %v277_v60  ;;  %v1831_v5 = vpack.c.bf16 %v310_v63, %v309_v62  ;;  %v288_v59 = vld [vmem:[%s2106_s30 + $0x2f8] sm:$0xff]  ;;  %v319_v60 = vld [vmem:[%s2106_s30 + $0x3f0] sm:$0xff]  ;;  %v1858_v63 = vpack.c.bf16 %v302_v57, %v301_v56  ;;  %v341_v21 = vld [vmem:[%s2106_s30 + $0x4a0] sm:$0xff] }
  0x3f   : > { %1755 = vmatprep.subr.msk.bf16.mxu1 %vm2110_vm1, %v1753_v6  ;;  %v261_v6 = vld [vmem:[%s2106_s30 + $0x220] sm:$0xff]  ;;  %v320_v61 = vld [vmem:[%s2106_s30 + $0x3f8] sm:$0xff] }
  0x40   : > { %v1786_v14 = vpack.c.bf16 %v262_v7, %v261_v6  ;;  %v303_v6 = vld [vmem:[%s2106_s30 + $0x370] sm:$0xff]  ;;  %v304_v7 = vld [vmem:[%s2106_s30 + $0x378] sm:$0xff]  ;;  %v345_v33 = vld [vmem:[%s2106_s30 + $0x4c0] sm:$0xff] }
  0x41   : > { %v324_v20 = vld [vmem:[%s2106_s30 + $0x418] sm:$0xff]  ;;  %v349_v45 = vld [vmem:[%s2106_s30 + $0x4e0] sm:$0xff] }
  0x42   : > { %v328_v32 = vld [vmem:[%s2106_s30 + $0x438] sm:$0xff] }
  0x43   : > { %v332_v44 = vld [vmem:[%s2106_s30 + $0x458] sm:$0xff] }
  0x44   : > { %v336_v56 = vld [vmem:[%s2106_s30 + $0x478] sm:$0xff] }
  0x45   : > { %1710 = vmatpush3.bf16.xpose.msk.msra.mxu0 %vm2110_vm1, %v1708_v15  ;;  %v1834_v15 = vpack.c.bf16 %v294_v9, %v293_v8  ;;  %v337_v8 = vld [vmem:[%s2106_s30 + $0x480] sm:$0xff]  ;;  %v338_v9 = vld [vmem:[%s2106_s30 + $0x488] sm:$0xff] }
  0x46   : > { %1758 = vmatpush3.bf16.xpose.msk.msra.mxu1 %vm2110_vm1, %v1756_v16  ;;  %1713 = vmatprep.subr.msk.bf16.mxu0 %vm2110_vm1, %v1711_v17  ;;  %v1789_v16 = vpack.c.bf16 %v280_v11, %v279_v10  ;;  %v1837_v17 = vpack.c.bf16 %v312_v13, %v311_v12  ;;  %v1864_v11 = vpack.c.bf16 %v304_v7, %v303_v6  ;;  %v321_v13 = vld [vmem:[%s2106_s30 + $0x400] sm:$0xff] }
  0x47   : > { %1761 = vmatprep.subr.msk.bf16.mxu1 %vm2110_vm1, %v1759_v18  ;;  %v263_v18 = vld [vmem:[%s2106_s30 + $0x230] sm:$0xff]  ;;  %v1867_v12 = vpack.c.bf16 %v338_v9, %v337_v8 }
  0x48   : > { %v1792_v26 = vpack.c.bf16 %v264_v19, %v263_v18  ;;  %v323_v19 = vld [vmem:[%s2106_s30 + $0x410] sm:$0xff] }
  0x4d   : > { %1716 = vmatpush3.bf16.xpose.msk.msra.mxu0 %vm2110_vm1, %v1714_v28  ;;  %v1795_v28 = vpack.c.bf16 %v282_v23, %v281_v22  ;;  %v342_v22 = vld [vmem:[%s2106_s30 + $0x4a8] sm:$0xff]  ;;  %v1876_v23 = vpack.c.bf16 %v324_v20, %v323_v19 }
  0x4e   : > { %1764 = vmatpush3.bf16.xpose.msk.msra.mxu1 %vm2110_vm1, %v1762_v29  ;;  %1719 = vmatprep.subr.msk.bf16.mxu0 %vm2110_vm1, %v1717_v30  ;;  %v1843_v29 = vpack.c.bf16 %v314_v25, %v313_v24  ;;  %v265_v30 = vld [vmem:[%s2106_s30 + $0x240] sm:$0xff]  ;;  %v1879_v24 = vpack.c.bf16 %v342_v22, %v341_v21 }
  0x4f   : > { %1767 = vmatprep.subr.msk.bf16.mxu1 %vm2110_vm1, %v1765_v31  ;;  %v266_v31 = vld [vmem:[%s2106_s30 + $0x248] sm:$0xff]  ;;  %v325_v25 = vld [vmem:[%s2106_s30 + $0x420] sm:$0xff] }
  0x50   : > { %v1798_v38 = vpack.c.bf16 %v266_v31, %v265_v30  ;;  %v327_v31 = vld [vmem:[%s2106_s30 + $0x430] sm:$0xff] }
  0x55   : > { %1722 = vmatpush3.bf16.xpose.msk.msra.mxu0 %vm2110_vm1, %v1720_v40  ;;  %v1801_v40 = vpack.c.bf16 %v284_v35, %v283_v34  ;;  %v346_v34 = vld [vmem:[%s2106_s30 + $0x4c8] sm:$0xff]  ;;  %v1888_v35 = vpack.c.bf16 %v328_v32, %v327_v31 }
  0x56   : > { %1770 = vmatpush3.bf16.xpose.msk.msra.mxu1 %vm2110_vm1, %v1768_v41  ;;  %1773 = vmatprep.subr.msk.bf16.mxu0 %vm2110_vm1, %v1771_v42  ;;  %v1849_v41 = vpack.c.bf16 %v316_v37, %v315_v36  ;;  %v267_v42 = vld [vmem:[%s2106_s30 + $0x250] sm:$0xff]  ;;  %v1891_v36 = vpack.c.bf16 %v346_v34, %v345_v33  ;;  %v329_v37 = vld [vmem:[%s2106_s30 + $0x440] sm:$0xff] }
  0x57   : > { %1821 = vmatprep.subr.msk.bf16.mxu1 %vm2110_vm1, %v1819_v43  ;;  %v268_v43 = vld [vmem:[%s2106_s30 + $0x258] sm:$0xff] }
  0x58   : > { %v1804_v50 = vpack.c.bf16 %v268_v43, %v267_v42  ;;  %v331_v43 = vld [vmem:[%s2106_s30 + $0x450] sm:$0xff] }
  0x5c   : > { %1538 = vmatmul.mubr.msk.f32.vlgmr.msra.gmra.mrb[0].mxu0 %vm359_vm0, %v2097_v0 }
  0x5d   : > { %1572 = vmatmul.mubr.msk.f32.vlgmr.msra.gmra.mrb[0].mxu1 %vm359_vm0, %v2097_v0  ;;  %1776 = vmatpush3.bf16.xpose.msk.msra.mxu0 %vm2110_vm1, %v1774_v52  ;;  %v1807_v52 = vpack.c.bf16 %v286_v47, %v285_v46  ;;  %v350_v46 = vld [vmem:[%s2106_s30 + $0x4e8] sm:$0xff]  ;;  %v1900_v47 = vpack.c.bf16 %v332_v44, %v331_v43 }
  0x5e   : > { %1824 = vmatpush3.bf16.xpose.msk.msra.mxu1 %vm2110_vm1, %v1822_v53  ;;  %1779 = vmatprep.subr.msk.bf16.mxu0 %vm2110_vm1, %v1777_v54  ;;  %v1855_v53 = vpack.c.bf16 %v318_v49, %v317_v48  ;;  %v269_v54 = vld [vmem:[%s2106_s30 + $0x260] sm:$0xff]  ;;  %v1903_v48 = vpack.c.bf16 %v350_v46, %v349_v45 }
  0x5f   : > { %1827 = vmatprep.subr.msk.bf16.mxu1 %vm2110_vm1, %v1825_v55  ;;  %1605 = vmatprep.mubr.msk.f32.mxu0 %vm359_vm0, %v2097_v0  ;;  %v270_v55 = vld [vmem:[%s2106_s30 + $0x268] sm:$0xff]  ;;  %v333_v49 = vld [vmem:[%s2106_s30 + $0x460] sm:$0xff] }
  0x60   : > { %1639 = vmatprep.mubr.msk.f32.mxu1 %vm359_vm0, %v2097_v0  ;;  %v1810_v62 = vpack.c.bf16 %v270_v55, %v269_v54  ;;  %v335_v55 = vld [vmem:[%s2106_s30 + $0x470] sm:$0xff] }
  0x61   : > { %v1912_v57 = vpack.c.bf16 %v336_v56, %v335_v55 }
  0x65   : > { %1782 = vmatpush3.bf16.xpose.msk.msra.mxu0 %vm2110_vm1, %v1780_v2  ;;  %v1813_v2 = vpack.c.bf16 %v288_v59, %v287_v58  ;;  %v2023_v58 = vmov 1983009808  }
  0x66   : > { %1830 = vmatpush3.bf16.xpose.msk.msra.mxu1 %vm2110_vm1, %v1828_v3  ;;  %1785 = vmatprep.subr.msk.bf16.mxu0 %vm2110_vm1, %v1783_v4  ;;  %v1861_v3 = vpack.c.bf16 %v320_v61, %v319_v60  ;;  %v271_v4 = vld [vmem:[%s2106_s30 + $0x270] sm:$0xff]  ;;  %v1211_v59 = vunpack.c.l.s4 %v2023_v58  ;;  %v1213_v60 = vlaneseq }
  0x67   : > { %1833 = vmatprep.subr.msk.bf16.mxu1 %vm2110_vm1, %v1831_v5  ;;  %v272_v5 = vld [vmem:[%s2106_s30 + $0x278] sm:$0xff] }
  0x68   : > { %v1816_v10 = vpack.c.bf16 %v272_v5, %v271_v4 }
  0x6d   : > { %1788 = vmatpush3.bf16.xpose.msk.msra.mxu0 %vm2110_vm1, %v1786_v14  ;;  %v322_v14 = vld [vmem:[%s2106_s30 + $0x408] sm:$0xff] }
  0x6e   : > { %1836 = vmatpush3.bf16.xpose.msk.msra.mxu1 %vm2110_vm1, %v1834_v15  ;;  %1791 = vmatprep.subr.msk.bf16.mxu0 %vm2110_vm1, %v1789_v16  ;;  %v339_v15 = vld [vmem:[%s2106_s30 + $0x490] sm:$0xff]  ;;  %v340_v16 = vld [vmem:[%s2106_s30 + $0x498] sm:$0xff] }
  0x6f   : > { %1839 = vmatprep.subr.msk.bf16.mxu1 %vm2110_vm1, %v1837_v17  ;;  %v1870_v17 = vpack.c.bf16 %v322_v14, %v321_v13  ;;  %v1873_v18 = vpack.c.bf16 %v340_v16, %v339_v15 }
  0x75   : > { %1794 = vmatpush3.bf16.xpose.msk.msra.mxu0 %vm2110_vm1, %v1792_v26  ;;  %v326_v26 = vld [vmem:[%s2106_s30 + $0x428] sm:$0xff] }
  0x76   : > { %1842 = vmatpush3.bf16.xpose.msk.msra.mxu1 %vm2110_vm1, %v1840_v27  ;;  %1797 = vmatprep.subr.msk.bf16.mxu0 %vm2110_vm1, %v1795_v28  ;;  %v343_v27 = vld [vmem:[%s2106_s30 + $0x4b0] sm:$0xff]  ;;  %v344_v28 = vld [vmem:[%s2106_s30 + $0x4b8] sm:$0xff] }
  0x77   : > { %1845 = vmatprep.subr.msk.bf16.mxu1 %vm2110_vm1, %v1843_v29  ;;  %v1882_v29 = vpack.c.bf16 %v326_v26, %v325_v25  ;;  %v1885_v30 = vpack.c.bf16 %v344_v28, %v343_v27 }
  0x7d   : > { %1800 = vmatpush3.bf16.xpose.msk.msra.mxu0 %vm2110_vm1, %v1798_v38  ;;  %v330_v38 = vld [vmem:[%s2106_s30 + $0x448] sm:$0xff] }
  0x7e   : > { %1848 = vmatpush3.bf16.xpose.msk.msra.mxu1 %vm2110_vm1, %v1846_v39  ;;  %1803 = vmatprep.subr.msk.bf16.mxu0 %vm2110_vm1, %v1801_v40  ;;  %v347_v39 = vld [vmem:[%s2106_s30 + $0x4d0] sm:$0xff]  ;;  %v348_v40 = vld [vmem:[%s2106_s30 + $0x4d8] sm:$0xff] }
  0x7f   : > { %1851 = vmatprep.subr.msk.bf16.mxu1 %vm2110_vm1, %v1849_v41  ;;  %v1894_v41 = vpack.c.bf16 %v330_v38, %v329_v37  ;;  %v1897_v42 = vpack.c.bf16 %v348_v40, %v347_v39 }
  0x85   : > { %1806 = vmatpush3.bf16.xpose.msk.msra.mxu0 %vm2110_vm1, %v1804_v50  ;;  %v334_v50 = vld [vmem:[%s2106_s30 + $0x468] sm:$0xff] }
  0x86   : > { %1854 = vmatpush3.bf16.xpose.msk.msra.mxu1 %vm2110_vm1, %v1852_v51  ;;  %1809 = vmatprep.subr.msk.bf16.mxu0 %vm2110_vm1, %v1807_v52  ;;  %v351_v51 = vld [vmem:[%s2106_s30 + $0x4f0] sm:$0xff]  ;;  %v352_v52 = vld [vmem:[%s2106_s30 + $0x4f8] sm:$0xff] }
  0x87   : > { %1857 = vmatprep.subr.msk.bf16.mxu1 %vm2110_vm1, %v1855_v53  ;;  %v1906_v53 = vpack.c.bf16 %v334_v50, %v333_v49  ;;  %v1909_v54 = vpack.c.bf16 %v352_v52, %v351_v51 }
  0x8d   : > { %1812 = vmatpush3.bf16.xpose.msk.msra.mxu0 %vm2110_vm1, %v1810_v62  ;;  %v1212_v62 = vunpack.c.0.s8 %v1211_v59 }
  0x8e   : > { %1860 = vmatpush3.bf16.xpose.msk.msra.mxu1 %vm2110_vm1, %v1858_v63  ;;  %1815 = vmatprep.subr.msk.bf16.mxu0 %vm2110_vm1, %v1813_v2  ;;  %v1214_v63 = vshrl.u32 %v1213_v60, 7 }
  0x8f   : > { %1863 = vmatprep.subr.msk.bf16.mxu1 %vm2110_vm1, %v1861_v3 }
  0x90   : > { %v1215_v7 = vsub.s32 %v1212_v62, %v1214_v63 }
  0x95   : > { %1818 = vmatpush3.bf16.xpose.msk.msra.mxu0 %vm2110_vm1, %v1816_v10 }
  0x96   : > { %1866 = vmatpush3.bf16.xpose.msk.msra.mxu1 %vm2110_vm1, %v1864_v11  ;;  %1869 = vmatprep.subr.msk.bf16.mxu0 %vm2110_vm1, %v1867_v12 }
  0x9c   : > { %1606 = vmatmul.mubr.msk.f32.vlgmr.msra.gmra.mrb[2].mxu0 %vm359_vm0, %v2097_v0 }
  0x9d   : > { %1640 = vmatmul.mubr.msk.f32.vlgmr.msra.gmra.mrb[2].mxu1 %vm359_vm0, %v2097_v0  ;;  %1872 = vmatpush3.bf16.xpose.msk.msra.mxu0 %vm2110_vm1, %v1870_v17 }
  0x9e   : > { %1875 = vmatprep.subr.msk.bf16.mxu0 %vm2110_vm1, %v1873_v18  ;;  %1673 = vmatprep.mubr.msk.f32.mxu0 %vm359_vm0, %v2097_v0 }
  0xa5   : > { %1878 = vmatpush3.bf16.xpose.msk.msra.mxu0 %vm2110_vm1, %v1876_v23 }
  0xa6   : > { %1881 = vmatprep.subr.msk.bf16.mxu0 %vm2110_vm1, %v1879_v24 }
  0xab   : > { %v357_v61 = vpop.permute.xlu0 %356 }
  0xad   : > { %1884 = vmatpush3.bf16.xpose.msk.msra.mxu0 %vm2110_vm1, %v1882_v29 }
  0xae   : > { %1887 = vmatprep.subr.msk.bf16.mxu0 %vm2110_vm1, %v1885_v30 }
  0xb5   : > { %1890 = vmatpush3.bf16.xpose.msk.msra.mxu0 %vm2110_vm1, %v1888_v35 }
  0xb6   : > { %1893 = vmatprep.subr.msk.bf16.mxu0 %vm2110_vm1, %v1891_v36 }
  0xbd   : > { %1896 = vmatpush3.bf16.xpose.msk.msra.mxu0 %vm2110_vm1, %v1894_v41 }
  0xbe   : > { %1899 = vmatprep.subr.msk.bf16.mxu0 %vm2110_vm1, %v1897_v42 }
  0xc5   : > { %1902 = vmatpush3.bf16.xpose.msk.msra.mxu0 %vm2110_vm1, %v1900_v47 }
  0xc6   : > { %1905 = vmatprep.subr.msk.bf16.mxu0 %vm2110_vm1, %v1903_v48 }
  0xcd   : > { %1908 = vmatpush3.bf16.xpose.msk.msra.mxu0 %vm2110_vm1, %v1906_v53 }
  0xce   : > { %1911 = vmatprep.subr.msk.bf16.mxu0 %vm2110_vm1, %v1909_v54 }
  0xd5   : > { %1914 = vmatpush3.bf16.xpose.msk.msra.mxu0 %vm2110_vm1, %v1912_v57 }
  0xdc   : > { %1674 = vmatmul.mubr.msk.f32.vlgmr.msra.gmra.mrb[4].mxu0 %vm359_vm0, %v2097_v0 }
 0x12f   : > { %v909_v2 = vpop.f32.mrb[0].mxu0 }
 0x130   : > { %v980_v3 = vpop.f32.mrb[0].mxu1  ;;  %v910_v4 = vadd.f32 %v909_v2, %v357_v61  ;;  %v911_v5 = vpop.f32.mrb[1].mxu0 }
 0x131   : > { %v912_v6 = vadd.f32 %v911_v5, %v357_v61  ;;  %v981_v8 = vadd.f32 %v980_v3, %v357_v61  ;;  %v982_v1 = vpop.f32.mrb[1].mxu1 }
 0x132   : > { %v983_v9 = vadd.f32 %v982_v1, %v357_v61 }
 0x133   : > { %v1208_v10 = vcombine.low %v910_v4, %v912_v6 }
 0x134   : > { %v1209_v0 = vcombine.low %v981_v8, %v983_v9 }
 0x135   : > { %v1216_v11 = vrot.slane %v1208_v10, %v1215_v7 }
 0x136   : > { %v1223_v12 = vrot.slane %v1209_v0, %v1215_v7 }
 0x138   : > { %v1224_v13 = vcombine.low %v1216_v11, %v1223_v12 }
 0x13a   : > { %1253 = vst [vmem:[%s176_s8] sm:$0xff] %v1224_v13 }
 0x16f   : > { %v1051_v14 = vpop.f32.mrb[2].mxu0 }
 0x170   : > { %v1052_v15 = vadd.f32 %v1051_v14, %v357_v61  ;;  %v1122_v16 = vpop.f32.mrb[2].mxu1  ;;  %v1053_v17 = vpop.f32.mrb[3].mxu0 }
 0x171   : > { %v1123_v18 = vadd.f32 %v1122_v16, %v357_v61  ;;  %v1054_v19 = vadd.f32 %v1053_v17, %v357_v61  ;;  %v1124_v20 = vpop.f32.mrb[3].mxu1 }
 0x172   : > { %v1125_v21 = vadd.f32 %v1124_v20, %v357_v61 }
 0x173   : > { %v1225_v22 = vcombine.low %v1052_v15, %v1054_v19 }
 0x174   : > { %v1226_v23 = vcombine.low %v1123_v18, %v1125_v21 }
 0x175   : > { %v1233_v24 = vrot.slane %v1225_v22, %v1215_v7 }
 0x176   : > { %v1240_v25 = vrot.slane %v1226_v23, %v1215_v7 }
 0x178   : > { %v1241_v26 = vcombine.low %v1233_v24, %v1240_v25 }
 0x17a   : > { %1254 = vst [vmem:[%s176_s8 + $0x8] sm:$0xff] %v1241_v26 }
 0x1af   : > { %v1193_v27 = vpop.f32.mrb[4].mxu0 }
 0x1b0   : > { %v1194_v28 = vadd.f32 %v1193_v27, %v357_v61  ;;  %v1195_v29 = vpop.f32.mrb[5].mxu0 }
 0x1b1   : > { %v1196_v30 = vadd.f32 %v1195_v29, %v357_v61 }
 0x1b3   : > { %v1242_v31 = vcombine.low %v1194_v28, %v1196_v30 }
 0x1b5   : > { %1500 = vst.sshfl [vmem:[%s176_s8 + $0x10] sm:$0x33 pattern:$0x76325410] %v1242_v31 }
 0x1b6   : > { %1971 = shalt.err (!%p1968_p3)
}
 0x1b7   : > { %s1972_s27 = scalar_lea.hbm %s2460_s19, 320  ;;  %s1976_s30 = scalar_lea.hbm %s2507_s3, 640 }
 0x1b8   : > { %p1973_p4 = scmp.ne.s32.totalorder %s2460_s19, %s1972_s27  ;;  %p1977_p9 = scmp.lt.u32.totalorder %s2460_s19, %s2507_s3 }
 0x1b9   : > { %p1978_p10 = scmp.lt.u32.totalorder %s1976_s30, %s1972_s27  ;;  %p1980_p12 = scmp.lt.u32.totalorder %s1972_s27, %s2460_s19 }
 0x1ba   : > { %p1974_p7 = pnand %p1973_p4, %p2083_p5 }
 0x1bb   : > { %p1979_p11 = por %p1978_p10, %p1977_p9 }
 0x1bc   : > { %p1975_p8 = pneg %p1974_p7 }
 0x1bd   : > { %p1981_p13 = por %p1980_p12, %p1979_p11 }
 0x1bf   : > { %p1982_p0 = pnand %p1981_p13, %p1975_p8 }
 0x1c1   : > { %1985 = shalt.err (!%p1982_p0)
}
 0x1c2   : > { %1916 = dma.vmem_to_hbm [thread:$0]  (%p2083_p5), %s2462_s10, 320, %s2460_s19, %s1257_s20  }
 0x1c3 PF: > { %p1922_p1 = scmp.ge.s32.totalorder %s2020_s15, 2  ;;  %s1283_s6 = sand.u32 1, %s2008_s12  }
 0x1c4   : > { %s1284_s7 = scalar_lea.sflag [#allocation3], %s1283_s6 }
 0x1c5   : > { %p1919_p2 = pnand %p1922_p1, %p2087_p6 }
 0x1c7   : > { %2003 = dma.done.wait (!%p1919_p2), %s1284_s7, 320  }
 0x1c8   : > { %2005 = vsyncadd (!%p1919_p2), %s1284_s7, 4294966976  ;;  %p13_p3 = scmp.ge.s32.totalorder %s2070_s18, 4   ;;  %s2512_s12 = smov %s2012_s13 }
 0x1c9   : > { %s2513_s13 = smov %s2016_s14  ;;  %s2514_s14 = smov %s2081_s21 }
 0x1ca   : > { %s2515_s15 = smov %s2070_s18  ;;  %15 = sbr.rel (!%p13_p3) target bundleno = 3 (0x3), region = 67 }
 0x1d1   :  { %1289 = vsyncpa [#allocation3], 1 }
 0x1d2   :  { %1291 = vsyncpa [#allocation3 + $0x1], 1 }

</bundles_post_ra>
